<compile_context>
chip_gen: v7x
topology: tpu7x:2x2x1
jax: 0.10.0
libtpu: 0.0.40
codegen_flags: <defaults>
</compile_context>

<pallas_src>
import math
import functools

import jax
import jax.numpy as jnp
from jax.experimental import pallas as pl
from jax.experimental.pallas import tpu as pltpu


def _round_up(v, m):
    return ((v + m - 1) // m) * m


def _shared_matrix_lowrank_kernel(x_ref, wt_ref, l1t_ref, l2t_ref, o_ref,
                                  acc_ref, h_ref):
    """Grid = (M_tiles, N_tiles, K_tiles); K is the reduction axis (innermost).

    x_ref  : (tm, tk)   input row tile
    wt_ref : (tk, tn)   pre-transposed dense weight tile (lane-dense)
    l1t_ref: (tk, r)    pre-transposed low-rank first factor tile
    l2t_ref: (r, tn)    pre-transposed low-rank second factor tile
    o_ref  : (tm, tn)   output tile
    acc_ref: (tm, tn)   f32 accumulator (VMEM scratch)
    h_ref  : (tm, r)    f32 low-rank hidden accumulator (VMEM scratch)
    """
    k = pl.program_id(2)

    @pl.when(k == 0)
    def _():
        acc_ref[...] = jnp.zeros_like(acc_ref)
        h_ref[...] = jnp.zeros_like(h_ref)

    x = x_ref[...]
    acc_ref[...] += jnp.dot(x, wt_ref[...], preferred_element_type=jnp.float32)
    h_ref[...] += jnp.dot(x, l1t_ref[...], preferred_element_type=jnp.float32)

    @pl.when(k == pl.num_programs(2) - 1)
    def _():
        # Low-rank correction applied once per (i, j) tile. astype is a no-op
        # for f32 params; matches input-dtype matmul behaviour for bf16 params.
        acc = acc_ref[...] + jnp.dot(h_ref[...].astype(l2t_ref.dtype),
                                     l2t_ref[...],
                                     preferred_element_type=jnp.float32)
        o_ref[...] = acc.astype(o_ref.dtype)


def _shared_matrix_kernel(x_ref, wt_ref, o_ref, acc_ref):
    k = pl.program_id(2)

    @pl.when(k == 0)
    def _():
        acc_ref[...] = jnp.zeros_like(acc_ref)

    acc_ref[...] += jnp.dot(x_ref[...], wt_ref[...],
                            preferred_element_type=jnp.float32)

    @pl.when(k == pl.num_programs(2) - 1)
    def _():
        o_ref[...] = acc_ref[...].astype(o_ref.dtype)


@functools.partial(jax.jit, static_argnames=("ignore_lowrank", "tm", "tn", "tk"))
def shared_matrix_forward(x, weight, lowrank_first=None, lowrank_second=None,
                          *, ignore_lowrank=False, tm=256, tn=256, tk=512):
    """Pallas implementation of SharedMatrix.forward (dense path, block_size=0)."""
    out_features, in_features = weight.shape
    lead_shape = x.shape[:-1]
    m = 1
    for d in lead_shape:
        m *= d
    x2 = x.reshape(m, in_features)

    use_lowrank = (lowrank_first is not None and lowrank_second is not None
                   and not ignore_lowrank)

    # ---- Effective tile sizes (shrink for small problems, keep HW alignment) ----
    m_align = _round_up(m, 8)
    tm_eff = tm if m_align >= tm else m_align            # multiple of 8
    m_pad = _round_up(m, tm_eff)

    n_align = _round_up(out_features, 128)
    tn_eff = tn if n_align >= tn else n_align            # multiple of 128 (lane-dense stores)
    n_pad = _round_up(out_features, tn_eff)

    k_align = _round_up(in_features, 128)
    tk_eff = tk if k_align >= tk else k_align            # multiple of 128
    k_pad = _round_up(in_features, tk_eff)

    grid = (m_pad // tm_eff, n_pad // tn_eff, k_pad // tk_eff)

    # ---- Pad inputs / pre-transpose weights ONCE in the wrapper (lane-dense) ----
    if m_pad != m or k_pad != in_features:
        x2 = jnp.pad(x2, ((0, m_pad - m), (0, k_pad - in_features)))
    w_t = weight.T                                        # [K, N]
    if k_pad != in_features or n_pad != out_features:
        w_t = jnp.pad(w_t, ((0, k_pad - in_features), (0, n_pad - out_features)))

    x_spec = pl.BlockSpec((tm_eff, tk_eff), lambda i, j, k: (i, k))
    w_spec = pl.BlockSpec((tk_eff, tn_eff), lambda i, j, k: (k, j))
    o_spec = pl.BlockSpec((tm_eff, tn_eff), lambda i, j, k: (i, j))
    cparams = pltpu.CompilerParams(
        dimension_semantics=("parallel", "parallel", "arbitrary"))

    if use_lowrank:
        r = lowrank_first.shape[0]
        l1_t = lowrank_first.T                            # [K, r]
        l2_t = lowrank_second.T                           # [r, N]
        if k_pad != in_features:
            l1_t = jnp.pad(l1_t, ((0, k_pad - in_features), (0, 0)))
        if n_pad != out_features:
            l2_t = jnp.pad(l2_t, ((0, 0), (0, n_pad - out_features)))

        out2 = pl.pallas_call(
            _shared_matrix_lowrank_kernel,
            out_shape=jax.ShapeDtypeStruct((m_pad, n_pad), x.dtype),
            grid_spec=pltpu.PrefetchScalarGridSpec(
                num_scalar_prefetch=0,
                grid=grid,
                in_specs=[
                    x_spec,
                    w_spec,
                    pl.BlockSpec((tk_eff, r), lambda i, j, k: (k, 0)),
                    pl.BlockSpec((r, tn_eff), lambda i, j, k: (0, j)),
                ],
                out_specs=o_spec,
                scratch_shapes=[
                    pltpu.VMEM((tm_eff, tn_eff), jnp.float32),
                    pltpu.VMEM((tm_eff, r), jnp.float32),
                ],
            ),
            compiler_params=cparams,
        )(x2, w_t, l1_t, l2_t)
    else:
        out2 = pl.pallas_call(
            _shared_matrix_kernel,
            out_shape=jax.ShapeDtypeStruct((m_pad, n_pad), x.dtype),
            grid_spec=pltpu.PrefetchScalarGridSpec(
                num_scalar_prefetch=0,
                grid=grid,
                in_specs=[x_spec, w_spec],
                out_specs=o_spec,
                scratch_shapes=[pltpu.VMEM((tm_eff, tn_eff), jnp.float32)],
            ),
            compiler_params=cparams,
        )(x2, w_t)

    out2 = out2[:m, :out_features]
    return out2.reshape(*lead_shape, out_features)


def init_shared_matrix_params(key, in_features, out_features, lowrank_dim=0,
                              dtype=jnp.float32):
    """Deterministic parameter init matching SharedMatrix.__init__ (block_size=0)."""
    std = math.sqrt(2.0 / (5 * min(out_features, in_features)))
    k_w, k_l1, k_l2 = jax.random.split(key, 3)
    weight = std * jax.random.normal(k_w, (out_features, in_features), dtype)
    if lowrank_dim:
        lowrank_first = std * jax.random.normal(k_l1, (lowrank_dim, in_features), dtype)
        lowrank_second = std * jax.random.normal(k_l2, (out_features, lowrank_dim), dtype)
    else:
        lowrank_first = lowrank_second = None
    return weight, lowrank_first, lowrank_second


def _reference(x, weight, lowrank_first=None, lowrank_second=None):
    hi = jax.lax.Precision.HIGHEST
    out = jnp.matmul(x, weight.T, precision=hi)
    if lowrank_first is not None and lowrank_second is not None:
        h = jnp.matmul(x, lowrank_first.T, precision=hi)
        out = out + jnp.matmul(h, lowrank_second.T, precision=hi)
    return out


if __name__ == "__main__":
    key = jax.random.PRNGKey(0)
    k_x, k_p, k_x2, k_p2 = jax.random.split(key, 4)

    # --- Small shapes consistent with the module: batch=2, seq=8, hidden=32. ---
    batch, seq, in_f, out_f, r = 2, 8, 32, 32, 8
    x = jax.random.normal(k_x, (batch, seq, in_f), jnp.float32)
    weight, l1, l2 = init_shared_matrix_params(k_p, in_f, out_f, r)

    out = jax.block_until_ready(shared_matrix_forward(x, weight, l1, l2))
    ref = _reference(x, weight, l1, l2)
    assert out.shape == (batch, seq, out_f)
    assert jnp.allclose(out, ref, atol=1e-2, rtol=1e-2), "mismatch vs reference (lowrank)"

    out_nl = jax.block_until_ready(
        shared_matrix_forward(x, weight, l1, l2, ignore_lowrank=True))
    assert jnp.allclose(out_nl, _reference(x, weight), atol=1e-2, rtol=1e-2), \
        "mismatch vs reference (ignore_lowrank)"

    # --- Medium shapes to exercise the (M, N, K) tiling, accumulator and padding. ---
    b2, s2, in2, out2_f, r2 = 3, 100, 640, 384, 16
    x_med = jax.random.normal(k_x2, (b2, s2, in2), jnp.float32)
    w2, l12, l22 = init_shared_matrix_params(k_p2, in2, out2_f, r2)
    out_med = jax.block_until_ready(shared_matrix_forward(x_med, w2, l12, l22))
    ref_med = _reference(x_med, w2, l12, l22)
    assert out_med.shape == (b2, s2, out2_f)
    assert jnp.allclose(out_med, ref_med, atol=2e-2, rtol=5e-3), \
        "mismatch vs reference (tiled path)"

    print("KERNEL_OK")
</pallas_src>

<mosaic_0001>
module attributes {stable_mosaic.version = 11 : i64} {
  func.func @_shared_matrix_lowrank_kernel(%arg0: i32, %arg1: i32, %arg2: i32, %arg3: memref<16x128xf32, #tpu.memory_space<vmem>>, %arg4: memref<128x128xf32, #tpu.memory_space<vmem>>, %arg5: memref<128x8xf32, #tpu.memory_space<vmem>>, %arg6: memref<8x128xf32, #tpu.memory_space<vmem>>, %arg7: memref<16x128xf32, #tpu.memory_space<vmem>>, %arg8: memref<16x128xf32, #tpu.memory_space<vmem>>, %arg9: memref<16x8xf32, #tpu.memory_space<vmem>>) attributes {dimension_semantics = [#tpu.dimension_semantics<parallel>, #tpu.dimension_semantics<parallel>, #tpu.dimension_semantics<arbitrary>], iteration_bounds = array<i64: 1, 1, 1>, scalar_prefetch = 0 : i64, scratch_operands = 2 : i64, tpu.core_type = #tpu.core_type<tc>, window_params = [{transform_indices = @transform_0, window_bounds = array<i64: 16, 128>}, {transform_indices = @transform_1, window_bounds = array<i64: 128, 128>}, {transform_indices = @transform_2, window_bounds = array<i64: 128, 8>}, {transform_indices = @transform_3, window_bounds = array<i64: 8, 128>}, {transform_indices = @transform_4, window_bounds = array<i64: 16, 128>}]} {
    %c0_i32 = arith.constant 0 : i32
    %0 = arith.cmpi eq, %arg2, %c0_i32 : i32
    %1 = arith.extui %0 : i1 to i32
    %c0_i32_0 = arith.constant 0 : i32
    %2 = arith.cmpi ne, %1, %c0_i32_0 : i32
    scf.if %2 {
      %cst_17 = arith.constant 0.000000e+00 : f32
      %17 = vector.broadcast %cst_17 : f32 to vector<16x128xf32>
      %c0_18 = arith.constant 0 : index
      %c0_19 = arith.constant 0 : index
      %18 = vector.load %arg8[%c0_18, %c0_19] : memref<16x128xf32, #tpu.memory_space<vmem>>, vector<16x128xf32>
      tpu.vector_store %arg8[%c0_18, %c0_19], %17 {strides = array<i32>} : memref<16x128xf32, #tpu.memory_space<vmem>>, vector<16x128xf32>,
      %cst_20 = arith.constant 0.000000e+00 : f32
      %19 = vector.broadcast %cst_20 : f32 to vector<16x8xf32>
      %c0_21 = arith.constant 0 : index
      %c0_22 = arith.constant 0 : index
      %20 = vector.load %arg9[%c0_21, %c0_22] : memref<16x8xf32, #tpu.memory_space<vmem>>, vector<16x8xf32>
      tpu.vector_store %arg9[%c0_21, %c0_22], %19 {strides = array<i32>} : memref<16x8xf32, #tpu.memory_space<vmem>>, vector<16x8xf32>,
    } else {
    }
    %c0 = arith.constant 0 : index
    %c0_1 = arith.constant 0 : index
    %3 = vector.load %arg3[%c0, %c0_1] : memref<16x128xf32, #tpu.memory_space<vmem>>, vector<16x128xf32>
    %c0_2 = arith.constant 0 : index
    %c0_3 = arith.constant 0 : index
    %4 = vector.load %arg8[%c0_2, %c0_3] : memref<16x128xf32, #tpu.memory_space<vmem>>, vector<16x128xf32>
    %c0_4 = arith.constant 0 : index
    %c0_5 = arith.constant 0 : index
    %5 = vector.load %arg4[%c0_4, %c0_5] : memref<128x128xf32, #tpu.memory_space<vmem>>, vector<128x128xf32>
    %cst = arith.constant dense<0.000000e+00> : vector<16x128xf32>
    %6 = tpu.matmul %3, %5, %cst {dimension_numbers = #tpu.dot_dimension_numbers<[1], [0], [0], [1], [0, 0, 1, 1], [], []>} : vector<16x128xf32>, vector<128x128xf32>, vector<16x128xf32> -> vector<16x128xf32>
    %7 = arith.addf %4, %6 : vector<16x128xf32>
    %c0_6 = arith.constant 0 : index
    %c0_7 = arith.constant 0 : index
    %8 = vector.load %arg8[%c0_6, %c0_7] : memref<16x128xf32, #tpu.memory_space<vmem>>, vector<16x128xf32>
    tpu.vector_store %arg8[%c0_6, %c0_7], %7 {strides = array<i32>} : memref<16x128xf32, #tpu.memory_space<vmem>>, vector<16x128xf32>,
    %c0_8 = arith.constant 0 : index
    %c0_9 = arith.constant 0 : index
    %9 = vector.load %arg9[%c0_8, %c0_9] : memref<16x8xf32, #tpu.memory_space<vmem>>, vector<16x8xf32>
    %c0_10 = arith.constant 0 : index
    %c0_11 = arith.constant 0 : index
    %10 = vector.load %arg5[%c0_10, %c0_11] : memref<128x8xf32, #tpu.memory_space<vmem>>, vector<128x8xf32>
    %cst_12 = arith.constant dense<0.000000e+00> : vector<16x8xf32>
    %11 = tpu.matmul %3, %10, %cst_12 {dimension_numbers = #tpu.dot_dimension_numbers<[1], [0], [0], [1], [0, 0, 1, 1], [], []>} : vector<16x128xf32>, vector<128x8xf32>, vector<16x8xf32> -> vector<16x8xf32>
    %12 = arith.addf %9, %11 : vector<16x8xf32>
    %c0_13 = arith.constant 0 : index
    %c0_14 = arith.constant 0 : index
    %13 = vector.load %arg9[%c0_13, %c0_14] : memref<16x8xf32, #tpu.memory_space<vmem>>, vector<16x8xf32>
    tpu.vector_store %arg9[%c0_13, %c0_14], %12 {strides = array<i32>} : memref<16x8xf32, #tpu.memory_space<vmem>>, vector<16x8xf32>,
    %c0_i32_15 = arith.constant 0 : i32
    %14 = arith.cmpi eq, %arg2, %c0_i32_15 : i32
    %15 = arith.extui %14 : i1 to i32
    %c0_i32_16 = arith.constant 0 : i32
    %16 = arith.cmpi ne, %15, %c0_i32_16 : i32
    scf.if %16 {
      %c0_17 = arith.constant 0 : index
      %c0_18 = arith.constant 0 : index
      %17 = vector.load %arg8[%c0_17, %c0_18] : memref<16x128xf32, #tpu.memory_space<vmem>>, vector<16x128xf32>
      %c0_19 = arith.constant 0 : index
      %c0_20 = arith.constant 0 : index
      %18 = vector.load %arg9[%c0_19, %c0_20] : memref<16x8xf32, #tpu.memory_space<vmem>>, vector<16x8xf32>
      %c0_21 = arith.constant 0 : index
      %c0_22 = arith.constant 0 : index
      %19 = vector.load %arg6[%c0_21, %c0_22] : memref<8x128xf32, #tpu.memory_space<vmem>>, vector<8x128xf32>
      %cst_23 = arith.constant dense<0.000000e+00> : vector<16x128xf32>
      %20 = tpu.matmul %18, %19, %cst_23 {dimension_numbers = #tpu.dot_dimension_numbers<[1], [0], [0], [1], [0, 0, 1, 1], [], []>} : vector<16x8xf32>, vector<8x128xf32>, vector<16x128xf32> -> vector<16x128xf32>
      %21 = arith.addf %17, %20 : vector<16x128xf32>
      %c0_24 = arith.constant 0 : index
      %c0_25 = arith.constant 0 : index
      %22 = vector.load %arg7[%c0_24, %c0_25] : memref<16x128xf32, #tpu.memory_space<vmem>>, vector<16x128xf32>
      tpu.vector_store %arg7[%c0_24, %c0_25], %21 {strides = array<i32>} : memref<16x128xf32, #tpu.memory_space<vmem>>, vector<16x128xf32>,
    } else {
    }
    return
  }
  func.func @transform_0(%arg0: i32, %arg1: i32, %arg2: i32) -> (i32, i32) {
    %c0_i32 = arith.constant 0 : i32
    return %arg0, %arg2 : i32, i32
  }
  func.func @transform_1(%arg0: i32, %arg1: i32, %arg2: i32) -> (i32, i32) {
    %c0_i32 = arith.constant 0 : i32
    return %arg2, %arg1 : i32, i32
  }
  func.func @transform_2(%arg0: i32, %arg1: i32, %arg2: i32) -> (i32, i32) {
    %c0_i32 = arith.constant 0 : i32
    %c0_i32_0 = arith.constant 0 : i32
    return %arg2, %c0_i32 : i32, i32
  }
  func.func @transform_3(%arg0: i32, %arg1: i32, %arg2: i32) -> (i32, i32) {
    %c0_i32 = arith.constant 0 : i32
    %c0_i32_0 = arith.constant 0 : i32
    return %c0_i32, %arg1 : i32, i32
  }
  func.func @transform_4(%arg0: i32, %arg1: i32, %arg2: i32) -> (i32, i32) {
    %c0_i32 = arith.constant 0 : i32
    return %arg0, %arg1 : i32, i32
  }
}

</mosaic_0001>

<bundles_post_ra>
// kernel: shared_matrix_forward.1
= control target key start
LH: loop header
LB: loop body
LE: loop exit
PB: predicated region body
PF: predicated region fallthrough
CT: control target
= control target key end

     0   :  { %vm23_vm0 = vcmask 64512   ;;  %v503_v3 = vmov 0.0   ;;  %s646_s2 = inlined_call_operand.vmem [shape: f32[128,8], index: 2, kind: input, shape index: {}]   ;;  %s647_s0 = inlined_call_operand.vmem [shape: f32[16,128], index: 0, kind: input, shape index: {}]   ;;  %s648_s1 = inlined_call_operand.vmem [shape: f32[128,128], index: 1, kind: input, shape index: {}]   ;;  %s649_s3 = inlined_call_operand.vmem [shape: f32[8,128], index: 3, kind: input, shape index: {}]   ;;  %s650_s4 = inlined_call_operand.vmem [shape: f32[16,128], index: 4, kind: output, shape index: {}]  }
   0x1   :  { %v127_v0 = vld [vmem:[%s646_s2] sm:$0xff]  ;;  %v128_v1 = vld [vmem:[%s646_s2 + $0x8] sm:$0xff]  ;;  %v129_v2 = vld [vmem:[%s646_s2 + $0x10] sm:$0xff]  ;;  %25 = vst.msk [vmem:[#allocation3 + $0x8] sm:$0xff] %vm23_vm0, %v503_v3 }
   0x2   :  { %24 = vst.msk [vmem:[#allocation3] sm:$0xff] %vm23_vm0, %v503_v3  ;;  %v468_v4 = vpack.c.bf16 %v128_v1, %v127_v0  ;;  %v130_v5 = vld [vmem:[%s646_s2 + $0x18] sm:$0xff]  ;;  %v131_v7 = vld [vmem:[%s646_s2 + $0x20] sm:$0xff]  ;;  %v132_v8 = vld [vmem:[%s646_s2 + $0x28] sm:$0xff] }
   0x3   :  { %v472_v6 = vpack.c.bf16 %v130_v5, %v129_v2  ;;  %v476_v9 = vpack.c.bf16 %v132_v8, %v131_v7  ;;  %v133_v10 = vld [vmem:[%s646_s2 + $0x30] sm:$0xff]  ;;  %v134_v11 = vld [vmem:[%s646_s2 + $0x38] sm:$0xff]  ;;  %v26_v12 = vld [vmem:[%s647_s0] sm:$0xff] }
   0x4   :  { %469 = vmatprep.subr.bf16.mxu1 %v468_v4  ;;  %428 = vmatprep.mubr.f32.mxu1 %v26_v12  ;;  %v30_v13 = vld [vmem:[%s648_s1] sm:$0xff]  ;;  %v31_v14 = vld [vmem:[%s648_s1 + $0x8] sm:$0xff]  ;;  %v32_v15 = vld [vmem:[%s648_s1 + $0x10] sm:$0xff]  ;;  %v480_v21 = vpack.c.bf16 %v134_v11, %v133_v10 }
   0x5   :  { %471 = vmatpush3.bf16.msra.mxu1 %v468_v4  ;;  %393 = vmatprep.mubr.f32.mxu0 %v26_v12  ;;  %v436_v16 = vpack.c.bf16 %v31_v14, %v30_v13  ;;  %v33_v17 = vld [vmem:[%s648_s1 + $0x18] sm:$0xff]  ;;  %v34_v19 = vld [vmem:[%s648_s1 + $0x20] sm:$0xff]  ;;  %v35_v20 = vld [vmem:[%s648_s1 + $0x28] sm:$0xff] }
   0x6   :  { %473 = vmatprep.subr.bf16.mxu1 %v472_v6  ;;  %v440_v18 = vpack.c.bf16 %v33_v17, %v32_v15  ;;  %v135_v22 = vld [vmem:[%s646_s2 + $0x40] sm:$0xff]  ;;  %v136_v23 = vld [vmem:[%s646_s2 + $0x48] sm:$0xff]  ;;  %v444_v24 = vpack.c.bf16 %v35_v20, %v34_v19  ;;  %v36_v25 = vld [vmem:[%s648_s1 + $0x30] sm:$0xff] }
   0x7   :  { %437 = vmatprep.subr.bf16.mxu0 %v436_v16  ;;  %v37_v26 = vld [vmem:[%s648_s1 + $0x38] sm:$0xff]  ;;  %v484_v27 = vpack.c.bf16 %v136_v23, %v135_v22  ;;  %v137_v28 = vld [vmem:[%s646_s2 + $0x50] sm:$0xff]  ;;  %v38_v31 = vld [vmem:[%s648_s1 + $0x40] sm:$0xff] }
   0x8   :  { %439 = vmatpush3.bf16.msra.mxu0 %v436_v16  ;;  %v138_v29 = vld [vmem:[%s646_s2 + $0x58] sm:$0xff]  ;;  %v448_v30 = vpack.c.bf16 %v37_v26, %v36_v25  ;;  %v39_v32 = vld [vmem:[%s648_s1 + $0x48] sm:$0xff]  ;;  %v139_v34 = vld [vmem:[%s646_s2 + $0x60] sm:$0xff] }
   0x9   :  { %475 = vmatpush3.bf16.msra.mxu1 %v472_v6  ;;  %441 = vmatprep.subr.bf16.mxu0 %v440_v18  ;;  %v488_v33 = vpack.c.bf16 %v138_v29, %v137_v28  ;;  %v140_v35 = vld [vmem:[%s646_s2 + $0x68] sm:$0xff]  ;;  %v452_v36 = vpack.c.bf16 %v39_v32, %v38_v31  ;;  %v40_v37 = vld [vmem:[%s648_s1 + $0x50] sm:$0xff]  ;;  %v41_v38 = vld [vmem:[%s648_s1 + $0x58] sm:$0xff] }
   0xa   :  { %477 = vmatprep.subr.bf16.mxu1 %v476_v9  ;;  %v492_v39 = vpack.c.bf16 %v140_v35, %v139_v34  ;;  %v141_v40 = vld [vmem:[%s646_s2 + $0x70] sm:$0xff]  ;;  %v142_v41 = vld [vmem:[%s646_s2 + $0x78] sm:$0xff]  ;;  %v456_v42 = vpack.c.bf16 %v41_v38, %v40_v37  ;;  %v42_v43 = vld [vmem:[%s648_s1 + $0x60] sm:$0xff] }
   0xb   :  { %v43_v44 = vld [vmem:[%s648_s1 + $0x68] sm:$0xff]  ;;  %v496_v45 = vpack.c.bf16 %v142_v41, %v141_v40  ;;  %v44_v47 = vld [vmem:[%s648_s1 + $0x70] sm:$0xff]  ;;  %v45_v48 = vld [vmem:[%s648_s1 + $0x78] sm:$0xff] }
   0xc   :  { %443 = vmatpush3.bf16.msra.mxu0 %v440_v18  ;;  %v460_v46 = vpack.c.bf16 %v43_v44, %v42_v43  ;;  %v464_v49 = vpack.c.bf16 %v45_v48, %v44_v47  ;;  %v27_v50 = vld [vmem:[%s647_s0 + $0x8] sm:$0xff]  ;;  %v230_v51 = vld [vmem:[%s649_s3] sm:$0xff] }
   0xd   :  { %479 = vmatpush3.bf16.msra.mxu1 %v476_v9  ;;  %445 = vmatprep.subr.bf16.mxu0 %v444_v24  ;;  %v126_v52 = vld [vmem:[#allocation3 + $0x8] sm:$0xff]  ;;  %v125_v53 = vld [vmem:[#allocation3] sm:$0xff] }
   0xe   :  { %481 = vmatprep.subr.bf16.mxu1 %v480_v21 }
  0x10   :  { %447 = vmatpush3.bf16.msra.mxu0 %v444_v24 }
  0x11   :  { %483 = vmatpush3.bf16.msra.mxu1 %v480_v21  ;;  %449 = vmatprep.subr.bf16.mxu0 %v448_v30 }
  0x12   :  { %485 = vmatprep.subr.bf16.mxu1 %v484_v27 }
  0x14   :  { %451 = vmatpush3.bf16.msra.mxu0 %v448_v30 }
  0x15   :  { %487 = vmatpush3.bf16.msra.mxu1 %v484_v27  ;;  %453 = vmatprep.subr.bf16.mxu0 %v452_v36 }
  0x16   :  { %489 = vmatprep.subr.bf16.mxu1 %v488_v33 }
  0x18   :  { %455 = vmatpush3.bf16.msra.mxu0 %v452_v36 }
  0x19   :  { %491 = vmatpush3.bf16.msra.mxu1 %v488_v33  ;;  %457 = vmatprep.subr.bf16.mxu0 %v456_v42 }
  0x1a   :  { %493 = vmatprep.subr.bf16.mxu1 %v492_v39 }
  0x1c   :  { %459 = vmatpush3.bf16.msra.mxu0 %v456_v42 }
  0x1d   :  { %495 = vmatpush3.bf16.msra.mxu1 %v492_v39  ;;  %461 = vmatprep.subr.bf16.mxu0 %v460_v46 }
  0x1e   :  { %497 = vmatprep.subr.bf16.mxu1 %v496_v45 }
  0x20   :  { %463 = vmatpush3.bf16.msra.mxu0 %v460_v46 }
  0x21   :  { %499 = vmatpush3.bf16.msra.mxu1 %v496_v45  ;;  %465 = vmatprep.subr.bf16.mxu0 %v464_v49 }
  0x24   :  { %429 = vmatmul.mubr.f32.vlgmr.msra.gmra.mrb[0].mxu1 %v27_v50  ;;  %467 = vmatpush3.bf16.msra.mxu0 %v464_v49 }
  0x25   :  { %431 = vmatprep.subr.mxu0 %v230_v51 }
  0x27   :  { %394 = vmatmul.mubr.f32.vlgmr.msra.gmra.mrb[0].mxu0 %v27_v50 }
  0x28   :  { %432 = vmatpush3.msra.mxu0 %v230_v51 }
  0xf7   :  { %v430_v54 = vpop.f32.mrb[0].mxu1 }
  0xf8   :  { %v219_v55 = vadd.f32 %v430_v54, %v126_v52  ;;  %v209_v56 = vpop.f32.mrb[1].mxu1 }
  0xf9   :  { %v218_v57 = vadd.f32 %v209_v56, %v125_v53 }
  0xfa   :  { %222 = vst.msk [vmem:[#allocation3 + $0x8] sm:$0xff] %vm23_vm0, %v219_v55 }
  0xfb   :  { %221 = vst.msk [vmem:[#allocation3] sm:$0xff] %vm23_vm0, %v218_v57 }
 0x101   :  { %v229_v59 = vld [vmem:[#allocation3 + $0x8] sm:$0xff] }
 0x102   :  { %v228_v58 = vld [vmem:[#allocation3] sm:$0xff] }
 0x103   :  { %433 = vmatprep.mubr.msk.f32.mxu0 %vm23_vm0, %v228_v58 }
 0x104   :  { %434 = vmatmul.mubr.msk.f32.vlgmr.msra.gmra.mrb[0].mxu0 %vm23_vm0, %v229_v59 }
 0x1d7   :  { %v435_v60 = vpop.f32.mrb[0].mxu0 }
 0x1d8   :  { %315 = vst [vmem:[%s650_s4 + $0x8] sm:$0xff] %v435_v60  ;;  %v303_v61 = vpop.f32.mrb[1].mxu0 }
 0x1d9   :  { %314 = vst [vmem:[%s650_s4] sm:$0xff] %v303_v61 }

</bundles_post_ra>
